<compile_context>
chip_gen: v5e
topology: v5e:2x2
jax: 0.10.0
libtpu: 0.0.40
codegen_flags: <defaults>
</compile_context>

<pallas_src>
import math
from functools import partial

import jax
import jax.numpy as jnp
from jax import lax
from jax.experimental import pallas as pl
from jax.experimental.pallas import tpu as pltpu


_INV_SQRT2 = 1.0 / math.sqrt(2.0)
_LN_EPS = 1e-5


def _round_up(x, m):
    return ((x + m - 1) // m) * m


def _vmem_budget_bytes():
    """~3/4 of physical per-core VMEM: ~48 MiB on v7x, ~96 MiB on v5e/v6e."""
    try:
        cap = int(pltpu.get_tpu_info().vmem_capacity_bytes)
    except Exception:  # no TPU info available -> conservative (v7x-sized) default
        cap = 64 * 1024 * 1024
    return (cap * 3) // 4


def _divisor_tiles(d):
    """Multiples of 128 that divide d, descending; [] if none."""
    return [t for t in range((d // 128) * 128, 127, -128) if d % t == 0]


# --------------------------------------------------------------------------- #
# Path A: weights fully VMEM-resident (single grid axis over row tiles).
# --------------------------------------------------------------------------- #
def _recycle_kernel_resident(x_ref, g_ref, beta_ref, w1_ref, b1_ref,
                             w2_ref, b2_ref, o_ref):
    x = x_ref[...].astype(jnp.float32)                            # (TN, D)
    mu = jnp.mean(x, axis=-1, keepdims=True)
    var = jnp.mean((x - mu) * (x - mu), axis=-1, keepdims=True)
    xn = (x - mu) * lax.rsqrt(var + _LN_EPS)
    xn = xn * g_ref[...].astype(jnp.float32) + beta_ref[...].astype(jnp.float32)

    h = jnp.dot(xn.astype(w1_ref.dtype), w1_ref[...],
                preferred_element_type=jnp.float32)
    h = h + b1_ref[...].astype(jnp.float32)
    # exact GELU: 0.5 * x * (1 + erf(x / sqrt(2)))   (matches nn.GELU default)
    h = 0.5 * h * (1.0 + lax.erf(h * _INV_SQRT2))

    y = jnp.dot(h.astype(w2_ref.dtype), w2_ref[...],
                preferred_element_type=jnp.float32)
    y = y + b2_ref[...].astype(jnp.float32)
    o_ref[...] = y.astype(o_ref.dtype)


# --------------------------------------------------------------------------- #
# Path B: hidden dim tiled on an inner ("arbitrary") axis, f32 accumulator.
# --------------------------------------------------------------------------- #
def _recycle_kernel_ktiled(x_ref, g_ref, beta_ref, w1_ref, b1_ref,
                           w2_ref, b2_ref, o_ref, xn_ref, acc_ref):
    k = pl.program_id(1)

    # Once per row tile: LayerNorm into a weight-dtype scratch (reused all k).
    @pl.when(k == 0)
    def _():
        x = x_ref[...].astype(jnp.float32)
        mu = jnp.mean(x, axis=-1, keepdims=True)
        var = jnp.mean((x - mu) * (x - mu), axis=-1, keepdims=True)
        xn = (x - mu) * lax.rsqrt(var + _LN_EPS)
        xn = xn * g_ref[...].astype(jnp.float32) + beta_ref[...].astype(jnp.float32)
        xn_ref[...] = xn.astype(xn_ref.dtype)

    # Linear-1 on this hidden slice, GELU, Linear-2 contribution.
    h = jnp.dot(xn_ref[...], w1_ref[...], preferred_element_type=jnp.float32)
    h = h + b1_ref[...].astype(jnp.float32)
    h = 0.5 * h * (1.0 + lax.erf(h * _INV_SQRT2))
    contrib = jnp.dot(h.astype(w2_ref.dtype), w2_ref[...],
                      preferred_element_type=jnp.float32)

    @pl.when(k == 0)
    def _():
        acc_ref[...] = contrib          # direct write: no b2 seed, no RMW

    @pl.when(k > 0)
    def _():
        acc_ref[...] += contrib

    @pl.when(k == pl.num_programs(1) - 1)
    def _():
        o_ref[...] = (acc_ref[...]
                      + b2_ref[...].astype(jnp.float32)).astype(o_ref.dtype)


# --------------------------------------------------------------------------- #
# Wrapper
# --------------------------------------------------------------------------- #
@partial(jax.jit, static_argnames=("tile_n", "tile_k", "force_path"))
def recycle_embedding(x, gamma, beta, w1, b1, w2, b2, *,
                      tile_n=256, tile_k=512, force_path=None):
    """x: (..., D). w1/w2 are [D_in, D_out]; gamma/beta/b1/b2 are [D]."""
    orig_shape = x.shape
    d = orig_shape[-1]
    x2 = x.reshape(-1, d)                                         # [N, D]
    n = x2.shape[0]

    x_bytes = jnp.dtype(x.dtype).itemsize
    w_bytes = jnp.dtype(w1.dtype).itemsize
    budget = _vmem_budget_bytes()
    small = 8 * 2 * d * 4                 # gamma/beta/b1/b2 blocks (generous)

    n8 = _round_up(max(n, 8), 8)

    def pick_tn(pref):
        tn = max(8, _round_up(min(pref, n8), 8))
        # keep >= 2 row tiles when there are enough rows (v7x has 2 TCs and
        # only the "parallel" axis is sharded across them).
        if n8 >= 16 and _round_up(n, tn) // tn < 2:
            tn = max(8, _round_up((n + 1) // 2, 8))
        return tn

    # ---- Path A (weight-resident) fit check: weights counted double-buffered
    #      to stay safe if Mosaic allocates two buffers per BlockSpec. ----
    tn_a = pick_tn(tile_n)
    est_a = 4 * d * d * w_bytes + 4 * tn_a * d * x_bytes + small
    cand_tk = [t for t in _divisor_tiles(d) if t <= max(tile_k, 128)]
    fits_a = est_a <= budget

    # ---- Path B (k-tiled) sizing: bigger row tile to amortize weight DMA ----
    tn_b = pick_tn(max(tile_n, 512))
    tk = cand_tk[0] if cand_tk else d
    est_b = est_a
    if cand_tk:
        while True:
            row_bytes = (4 * tn_b * d * x_bytes      # x + out tiles (dbl-buffered)
                         + tn_b * d * w_bytes        # LN scratch (weight dtype)
                         + tn_b * d * 4              # f32 accumulator
                         + small)
            rem = budget - row_bytes
            fitting = [t for t in cand_tk if 4 * d * t * w_bytes <= rem]
            if fitting or tn_b <= 8:
                break
            tn_b = max(8, _round_up(tn_b // 2, 8))
        tk = fitting[0] if fitting else cand_tk[-1]
        est_b = row_bytes + 4 * d * tk * w_bytes

    use_resident = fits_a or not cand_tk
    if force_path == "resident":
        use_resident = True
    elif force_path == "ktiled" and cand_tk:
        use_resident = False

    # per-feature params as lane-dense (1, D) rows (native dtype; f32 in-kernel)
    g2 = gamma.reshape(1, d)
    be2 = beta.reshape(1, d)
    b1_2 = b1.reshape(1, d)
    b2_2 = b2.reshape(1, d)

    if use_resident:
        tn = tn_a
        n_pad = _round_up(n, tn)
        if n_pad != n:
            x2 = jnp.pad(x2, ((0, n_pad - n), (0, 0)))
        vmem_limit = max(budget, int(est_a * 1.25))

        out = pl.pallas_call(
            _recycle_kernel_resident,
            out_shape=jax.ShapeDtypeStruct((n_pad, d), x.dtype),
            grid_spec=pltpu.PrefetchScalarGridSpec(
                num_scalar_prefetch=0,
                grid=(n_pad // tn,),
                in_specs=[
                    pl.BlockSpec((tn, d), lambda i: (i, 0)),      # x row tile
                    pl.BlockSpec((1, d), lambda i: (0, 0)),       # gamma
                    pl.BlockSpec((1, d), lambda i: (0, 0)),       # beta
                    pl.BlockSpec((d, d), lambda i: (0, 0)),       # W1 (resident)
                    pl.BlockSpec((1, d), lambda i: (0, 0)),       # b1
                    pl.BlockSpec((d, d), lambda i: (0, 0)),       # W2 (resident)
                    pl.BlockSpec((1, d), lambda i: (0, 0)),       # b2
                ],
                out_specs=pl.BlockSpec((tn, d), lambda i: (i, 0)),
            ),
            compiler_params=pltpu.CompilerParams(
                dimension_semantics=("parallel",),
                vmem_limit_bytes=vmem_limit,
            ),
        )(x2, g2, be2, w1, b1_2, w2, b2_2)
    else:
        tn = tn_b
        n_pad = _round_up(n, tn)
        if n_pad != n:
            x2 = jnp.pad(x2, ((0, n_pad - n), (0, 0)))
        vmem_limit = max(budget, int(est_b * 1.25))

        out = pl.pallas_call(
            _recycle_kernel_ktiled,
            out_shape=jax.ShapeDtypeStruct((n_pad, d), x.dtype),
            grid_spec=pltpu.PrefetchScalarGridSpec(
                num_scalar_prefetch=0,
                grid=(n_pad // tn, d // tk),
                in_specs=[
                    pl.BlockSpec((tn, d), lambda i, k: (i, 0)),   # x row tile
                    pl.BlockSpec((1, d), lambda i, k: (0, 0)),    # gamma
                    pl.BlockSpec((1, d), lambda i, k: (0, 0)),    # beta
                    pl.BlockSpec((d, tk), lambda i, k: (0, k)),   # W1 hidden slice
                    pl.BlockSpec((1, tk), lambda i, k: (0, k)),   # b1 hidden slice
                    pl.BlockSpec((tk, d), lambda i, k: (k, 0)),   # W2 hidden slice
                    pl.BlockSpec((1, d), lambda i, k: (0, 0)),    # b2
                ],
                out_specs=pl.BlockSpec((tn, d), lambda i, k: (i, 0)),
                scratch_shapes=[
                    pltpu.VMEM((tn, d), w1.dtype),                # LN(x) cache
                    pltpu.VMEM((tn, d), jnp.float32),             # output accumulator
                ],
            ),
            compiler_params=pltpu.CompilerParams(
                dimension_semantics=("parallel", "arbitrary"),
                vmem_limit_bytes=vmem_limit,
            ),
        )(x2, g2, be2, w1, b1_2, w2, b2_2)

    if n_pad != n:
        out = out[:n]
    return out.reshape(orig_shape)


def _reference(x, gamma, beta, w1, b1, w2, b2):
    """Plain-JAX reference mirroring the PyTorch module (f32 math)."""
    xf = x.astype(jnp.float32)
    mu = jnp.mean(xf, axis=-1, keepdims=True)
    var = jnp.mean((xf - mu) ** 2, axis=-1, keepdims=True)
    xn = (xf - mu) / jnp.sqrt(var + _LN_EPS) * gamma.astype(jnp.float32) \
        + beta.astype(jnp.float32)
    h = xn @ w1.astype(jnp.float32) + b1.astype(jnp.float32)
    h = 0.5 * h * (1.0 + lax.erf(h / math.sqrt(2.0)))
    return h @ w2.astype(jnp.float32) + b2.astype(jnp.float32)


if __name__ == "__main__":
    # Small shapes implied by the forward: x is (batch, seq, dim).
    batch, seq, dim = 2, 8, 128
    key = jax.random.PRNGKey(0)
    kx, kg, kb, kw1, kb1, kw2, kb2 = jax.random.split(key, 7)

    x = jax.random.normal(kx, (batch, seq, dim), dtype=jnp.float32)

    # nn.LayerNorm(dim) + 2x nn.Linear(dim, dim); weights stored [in, out].
    gamma = 1.0 + 0.02 * jax.random.normal(kg, (dim,), dtype=jnp.float32)
    beta = 0.02 * jax.random.normal(kb, (dim,), dtype=jnp.float32)
    scale = 1.0 / math.sqrt(dim)
    w1 = scale * jax.random.normal(kw1, (dim, dim), dtype=jnp.float32)
    b1 = scale * jax.random.normal(kb1, (dim,), dtype=jnp.float32)
    w2 = scale * jax.random.normal(kw2, (dim, dim), dtype=jnp.float32)
    b2 = scale * jax.random.normal(kb2, (dim,), dtype=jnp.float32)

    # --- f32 path (weight-resident fast path) ---
    y = jax.block_until_ready(recycle_embedding(x, gamma, beta, w1, b1, w2, b2))
    y_ref = _reference(x, gamma, beta, w1, b1, w2, b2)
    assert y.shape == x.shape
    assert jnp.allclose(y, y_ref, atol=1e-3, rtol=1e-3), "f32 mismatch vs reference"

    # --- token count not a multiple of the tile (padded grid path) ---
    x_odd = jax.random.normal(kx, (3, 7, dim), dtype=jnp.float32)
    y_odd = jax.block_until_ready(
        recycle_embedding(x_odd, gamma, beta, w1, b1, w2, b2))
    y_odd_ref = _reference(x_odd, gamma, beta, w1, b1, w2, b2)
    assert y_odd.shape == x_odd.shape
    assert jnp.allclose(y_odd, y_odd_ref, atol=1e-3, rtol=1e-3), "padded-path mismatch"

    # --- bf16 I/O path (native MXU input dtype, f32 accumulation in-kernel) ---
    bf = jnp.bfloat16
    y_bf = jax.block_until_ready(
        recycle_embedding(x.astype(bf), gamma.astype(bf), beta.astype(bf),
                          w1.astype(bf), b1.astype(bf), w2.astype(bf),
                          b2.astype(bf)))
    assert y_bf.dtype == bf
    assert bool(jnp.all(jnp.isfinite(y_bf.astype(jnp.float32))))
    assert jnp.allclose(y_bf.astype(jnp.float32), y_ref, atol=1e-1, rtol=1e-1), \
        "bf16 path diverged from f32 reference beyond bf16 tolerance"

    # --- force the k-tiled (large-D) path to exercise the accumulator kernel ---
    dim2 = 256
    kx2, kw1b, kw2b = jax.random.split(kx, 3)
    x2 = jax.random.normal(kx2, (batch, seq, dim2), dtype=jnp.float32)
    g2 = jnp.ones((dim2,), jnp.float32)
    be2 = jnp.zeros((dim2,), jnp.float32)
    s2 = 1.0 / math.sqrt(dim2)
    w1b = s2 * jax.random.normal(kw1b, (dim2, dim2), dtype=jnp.float32)
    b1b = jnp.zeros((dim2,), jnp.float32)
    w2b = s2 * jax.random.normal(kw2b, (dim2, dim2), dtype=jnp.float32)
    b2b = 0.01 * jnp.ones((dim2,), jnp.float32)
    y_kt = jax.block_until_ready(
        recycle_embedding(x2, g2, be2, w1b, b1b, w2b, b2b,
                          tile_k=128, force_path="ktiled"))
    y_kt_ref = _reference(x2, g2, be2, w1b, b1b, w2b, b2b)
    assert jnp.allclose(y_kt, y_kt_ref, atol=1e-3, rtol=1e-3), "k-tiled path mismatch"

    print("KERNEL_OK")
</pallas_src>

<mosaic_0001>
module attributes {stable_mosaic.version = 11 : i64} {
  func.func @_recycle_kernel_resident(%arg0: i32, %arg1: memref<8x128xf32, #tpu.memory_space<vmem>>, %arg2: memref<1x128xf32, #tpu.memory_space<vmem>>, %arg3: memref<1x128xf32, #tpu.memory_space<vmem>>, %arg4: memref<128x128xf32, #tpu.memory_space<vmem>>, %arg5: memref<1x128xf32, #tpu.memory_space<vmem>>, %arg6: memref<128x128xf32, #tpu.memory_space<vmem>>, %arg7: memref<1x128xf32, #tpu.memory_space<vmem>>, %arg8: memref<8x128xf32, #tpu.memory_space<vmem>>) attributes {dimension_semantics = [#tpu.dimension_semantics<parallel>], iteration_bounds = array<i64: 2>, scalar_prefetch = 0 : i64, scratch_operands = 0 : i64, tpu.core_type = #tpu.core_type<tc>, window_params = [{transform_indices = @transform_0, window_bounds = array<i64: 8, 128>}, {pipeline_mode = #tpu.pipeline_mode<synchronous>, transform_indices = @transform_1, window_bounds = array<i64: 1, 128>}, {pipeline_mode = #tpu.pipeline_mode<synchronous>, transform_indices = @transform_2, window_bounds = array<i64: 1, 128>}, {pipeline_mode = #tpu.pipeline_mode<synchronous>, transform_indices = @transform_3, window_bounds = array<i64: 128, 128>}, {pipeline_mode = #tpu.pipeline_mode<synchronous>, transform_indices = @transform_4, window_bounds = array<i64: 1, 128>}, {pipeline_mode = #tpu.pipeline_mode<synchronous>, transform_indices = @transform_5, window_bounds = array<i64: 128, 128>}, {pipeline_mode = #tpu.pipeline_mode<synchronous>, transform_indices = @transform_6, window_bounds = array<i64: 1, 128>}, {transform_indices = @transform_7, window_bounds = array<i64: 8, 128>}]} {
    %c0 = arith.constant 0 : index
    %c0_0 = arith.constant 0 : index
    %0 = vector.load %arg1[%c0, %c0_0] : memref<8x128xf32, #tpu.memory_space<vmem>>, vector<8x128xf32>
    %cst = arith.constant dense<0.000000e+00> : vector<8xf32>
    %1 = vector.multi_reduction <add>, %0, %cst [1] : vector<8x128xf32> to vector<8xf32>
    %2 = vector.shape_cast %1 : vector<8xf32> to vector<8x1xf32>
    %cst_1 = arith.constant 1.280000e+02 : f32
    %3 = vector.broadcast %cst_1 : f32 to vector<8x1xf32>
    %4 = arith.divf %2, %3 : vector<8x1xf32>
    %5 = vector.broadcast %4 : vector<8x1xf32> to vector<8x128xf32>
    %6 = arith.subf %0, %5 : vector<8x128xf32>
    %7 = vector.broadcast %4 : vector<8x1xf32> to vector<8x128xf32>
    %8 = arith.subf %0, %7 : vector<8x128xf32>
    %9 = arith.mulf %6, %8 : vector<8x128xf32>
    %cst_2 = arith.constant dense<0.000000e+00> : vector<8xf32>
    %10 = vector.multi_reduction <add>, %9, %cst_2 [1] : vector<8x128xf32> to vector<8xf32>
    %11 = vector.shape_cast %10 : vector<8xf32> to vector<8x1xf32>
    %cst_3 = arith.constant 1.280000e+02 : f32
    %12 = vector.broadcast %cst_3 : f32 to vector<8x1xf32>
    %13 = arith.divf %11, %12 : vector<8x1xf32>
    %14 = vector.broadcast %4 : vector<8x1xf32> to vector<8x128xf32>
    %15 = arith.subf %0, %14 : vector<8x128xf32>
    %cst_4 = arith.constant 9.99999974E-6 : f32
    %16 = vector.broadcast %cst_4 : f32 to vector<8x1xf32>
    %17 = arith.addf %13, %16 : vector<8x1xf32>
    %18 = math.rsqrt %17 : vector<8x1xf32>
    %19 = vector.broadcast %18 : vector<8x1xf32> to vector<8x128xf32>
    %20 = arith.mulf %15, %19 : vector<8x128xf32>
    %c0_5 = arith.constant 0 : index
    %c0_6 = arith.constant 0 : index
    %21 = vector.load %arg2[%c0_5, %c0_6] : memref<1x128xf32, #tpu.memory_space<vmem>>, vector<1x128xf32>
    %22 = vector.broadcast %21 : vector<1x128xf32> to vector<8x128xf32>
    %23 = arith.mulf %20, %22 : vector<8x128xf32>
    %c0_7 = arith.constant 0 : index
    %c0_8 = arith.constant 0 : index
    %24 = vector.load %arg3[%c0_7, %c0_8] : memref<1x128xf32, #tpu.memory_space<vmem>>, vector<1x128xf32>
    %25 = vector.broadcast %24 : vector<1x128xf32> to vector<8x128xf32>
    %26 = arith.addf %23, %25 : vector<8x128xf32>
    %c0_9 = arith.constant 0 : index
    %c0_10 = arith.constant 0 : index
    %27 = vector.load %arg4[%c0_9, %c0_10] : memref<128x128xf32, #tpu.memory_space<vmem>>, vector<128x128xf32>
    %cst_11 = arith.constant dense<0.000000e+00> : vector<8x128xf32>
    %28 = tpu.matmul %26, %27, %cst_11 {dimension_numbers = #tpu.dot_dimension_numbers<[1], [0], [0], [1], [0, 0, 1, 1], [], []>} : vector<8x128xf32>, vector<128x128xf32>, vector<8x128xf32> -> vector<8x128xf32>
    %c0_12 = arith.constant 0 : index
    %c0_13 = arith.constant 0 : index
    %29 = vector.load %arg5[%c0_12, %c0_13] : memref<1x128xf32, #tpu.memory_space<vmem>>, vector<1x128xf32>
    %30 = vector.broadcast %29 : vector<1x128xf32> to vector<8x128xf32>
    %31 = arith.addf %28, %30 : vector<8x128xf32>
    %cst_14 = arith.constant 5.000000e-01 : f32
    %32 = vector.broadcast %cst_14 : f32 to vector<8x128xf32>
    %33 = arith.mulf %32, %31 : vector<8x128xf32>
    %cst_15 = arith.constant 0.707106769 : f32
    %34 = vector.broadcast %cst_15 : f32 to vector<8x128xf32>
    %35 = arith.mulf %31, %34 : vector<8x128xf32>
    %36 = math.erf %35 : vector<8x128xf32>
    %cst_16 = arith.constant 1.000000e+00 : f32
    %37 = vector.broadcast %cst_16 : f32 to vector<8x128xf32>
    %38 = arith.addf %37, %36 : vector<8x128xf32>
    %39 = arith.mulf %33, %38 : vector<8x128xf32>
    %c0_17 = arith.constant 0 : index
    %c0_18 = arith.constant 0 : index
    %40 = vector.load %arg6[%c0_17, %c0_18] : memref<128x128xf32, #tpu.memory_space<vmem>>, vector<128x128xf32>
    %cst_19 = arith.constant dense<0.000000e+00> : vector<8x128xf32>
    %41 = tpu.matmul %39, %40, %cst_19 {dimension_numbers = #tpu.dot_dimension_numbers<[1], [0], [0], [1], [0, 0, 1, 1], [], []>} : vector<8x128xf32>, vector<128x128xf32>, vector<8x128xf32> -> vector<8x128xf32>
    %c0_20 = arith.constant 0 : index
    %c0_21 = arith.constant 0 : index
    %42 = vector.load %arg7[%c0_20, %c0_21] : memref<1x128xf32, #tpu.memory_space<vmem>>, vector<1x128xf32>
    %43 = vector.broadcast %42 : vector<1x128xf32> to vector<8x128xf32>
    %44 = arith.addf %41, %43 : vector<8x128xf32>
    %c0_22 = arith.constant 0 : index
    %c0_23 = arith.constant 0 : index
    %45 = vector.load %arg8[%c0_22, %c0_23] : memref<8x128xf32, #tpu.memory_space<vmem>>, vector<8x128xf32>
    tpu.vector_store %arg8[%c0_22, %c0_23], %44 {strides = array<i32>} : memref<8x128xf32, #tpu.memory_space<vmem>>, vector<8x128xf32>,
    return
  }
  func.func @transform_0(%arg0: i32) -> (i32, i32) {
    %c0_i32 = arith.constant 0 : i32
    %c0_i32_0 = arith.constant 0 : i32
    return %arg0, %c0_i32 : i32, i32
  }
  func.func @transform_1(%arg0: i32) -> (i32, i32) {
    %c0_i32 = arith.constant 0 : i32
    %c0_i32_0 = arith.constant 0 : i32
    %c0_i32_1 = arith.constant 0 : i32
    return %c0_i32, %c0_i32_0 : i32, i32
  }
  func.func @transform_2(%arg0: i32) -> (i32, i32) {
    %c0_i32 = arith.constant 0 : i32
    %c0_i32_0 = arith.constant 0 : i32
    %c0_i32_1 = arith.constant 0 : i32
    return %c0_i32, %c0_i32_0 : i32, i32
  }
  func.func @transform_3(%arg0: i32) -> (i32, i32) {
    %c0_i32 = arith.constant 0 : i32
    %c0_i32_0 = arith.constant 0 : i32
    %c0_i32_1 = arith.constant 0 : i32
    return %c0_i32, %c0_i32_0 : i32, i32
  }
  func.func @transform_4(%arg0: i32) -> (i32, i32) {
    %c0_i32 = arith.constant 0 : i32
    %c0_i32_0 = arith.constant 0 : i32
    %c0_i32_1 = arith.constant 0 : i32
    return %c0_i32, %c0_i32_0 : i32, i32
  }
  func.func @transform_5(%arg0: i32) -> (i32, i32) {
    %c0_i32 = arith.constant 0 : i32
    %c0_i32_0 = arith.constant 0 : i32
    %c0_i32_1 = arith.constant 0 : i32
    return %c0_i32, %c0_i32_0 : i32, i32
  }
  func.func @transform_6(%arg0: i32) -> (i32, i32) {
    %c0_i32 = arith.constant 0 : i32
    %c0_i32_0 = arith.constant 0 : i32
    %c0_i32_1 = arith.constant 0 : i32
    return %c0_i32, %c0_i32_0 : i32, i32
  }
  func.func @transform_7(%arg0: i32) -> (i32, i32) {
    %c0_i32 = arith.constant 0 : i32
    %c0_i32_0 = arith.constant 0 : i32
    return %arg0, %c0_i32 : i32, i32
  }
}

</mosaic_0001>

<bundles_post_ra>
// kernel: recycle_embedding.1
= control target key start
LH: loop header
LB: loop body
LE: loop exit
PB: predicated region body
PF: predicated region fallthrough
CT: control target
= control target key end

     0   :  { %s1062_s0 = inlined_call_operand.hbm [shape: f32[16,128], index: 0, kind: input, shape index: {}]   ;;  %s1063_s1 = inlined_call_operand.vmem [shape: f32[1,128], index: 1, kind: input, shape index: {}]   ;;  %s1064_s2 = inlined_call_operand.vmem [shape: f32[1,128], index: 2, kind: input, shape index: {}]   ;;  %s1065_s3 = inlined_call_operand.hbm [shape: f32[128,128], index: 3, kind: input, shape index: {}]   ;;  %s1066_s4 = inlined_call_operand.vmem [shape: f32[1,128], index: 4, kind: input, shape index: {}]   ;;  %s1067_s5 = inlined_call_operand.hbm [shape: f32[128,128], index: 5, kind: input, shape index: {}]   ;;  %s1068_s6 = inlined_call_operand.vmem [shape: f32[1,128], index: 6, kind: input, shape index: {}]   ;;  %s1069_s7 = inlined_call_operand.hbm [shape: f32[16,128], index: 7, kind: output, shape index: {}]  }
   0x1   :  { %1070 = sst [smem:[#allocation12_spill]] %s1065_s3 }
   0x2   :  { %1071 = sst [smem:[#allocation13_spill]] %s1067_s5 }
   0x3   :  { %12 = vsyncpa [#allocation3], 0 }
   0x4   :  { %14 = vsyncpa [#allocation3 + $0x1], 0 }
   0x5   :  { %15 = vsyncpa [#allocation6], 0 }
   0x6   :  { %16 = vsyncpa [#allocation4], 0 }
   0x7   :  { %18 = vsyncpa [#allocation4 + $0x1], 0  ;;  %s901_s24 = smov 0   ;;  %s903_s25 = smov 0  }
   0x8   :  { %s905_s26 = smov 0   ;;  %s907_s27 = smov 0  }
   0x9 LB: > { %s1072_s3 = sld [smem:[#allocation12_spill]]  ;;  %s925_s8 = sadd.s32 4294967295, %s854_s27   ;;  %s854_s27 = sphi %s907_s27, %s1084_s27   ;;  %s850_s26 = sphi %s905_s26, %s1083_s26   ;;  %s846_s25 = sphi %s903_s25, %s1082_s25   ;;  %s842_s24 = sphi %s901_s24, %s1081_s24  }
   0xa   : > { %p598_p0 = scmp.ge.s32.totalorder %s854_s27, 1  ;;  %p45_p1 = scmp.eq.s32.totalorder %s925_s8, 0 }
   0xb   : > { %p207_p2 = scmp.lt.s32.totalorder %s854_s27, 3  ;;  %s856_s10 = smov [#allocation5]  }
   0xc   : > { %s226_s11 = sshll.u32 %s856_s10, 4  ;;  %s1074_s5 = sld [smem:[#allocation13_spill]]  ;;  %s227_s11 = int_to_ptr.vmem [resolvable:$true] %s226_s11 }
   0xd   : > { %p930_p3 = pnand %p598_p0, %p207_p2  ;;  %s857_s15 = smov [#allocation7]  }
   0xe   : > { %s243_s16 = sshll.u32 %s857_s15, 4  ;;  %s858_s17 = smov 128   ;;  %s244_s16 = int_to_ptr.vmem [resolvable:$true] %s243_s16 }
   0xf   : > { %s224_s30 = sshll.u32 %s1072_s3, 4  ;;  %p626_p4 = pneg %p930_p3  ;;  %s225_s30 = int_to_ptr.hbm [resolvable:$true] %s224_s30 }
  0x10   : > { %s859_s18 = smov 8   ;;  %s597_s19 = sadd.s32 4294967294, %s854_s27  }
  0x11   : > { %p627_p6 = pnand %p626_p4, %p45_p1  ;;  %s944_s20 = sadd.s32 1, %s854_s27  }
  0x12   : > { %s241_s14 = sshll.u32 %s1074_s5, 4  ;;  %s28_s21 = ssub.s32 %s854_s27, %s944_s20  ;;  %s242_s14 = int_to_ptr.hbm [resolvable:$true] %s241_s14 }
  0x13   : > { %629 = dma.hbm_to_vmem [thread:$0]  (!%p627_p6), %s225_s30, 2048, %s227_s11, [#allocation6], %s858_s17, %s858_s17, %s859_s18  }
  0x14   : > { %632 = dma.hbm_to_vmem [thread:$0]  (!%p627_p6), %s242_s14, 2048, %s244_s16, [#allocation6], %s858_s17, %s858_s17, %s859_s18  }
  0x15   : > { %s31_s22 = sadd.s32 1, %s850_s26  ;;  %p29_p7 = scmp.eq.s32.totalorder %s28_s21, 0 }
  0x16   : > { %p38_p8 = scmp.ne.s32.totalorder %s850_s26, %s846_s25  ;;  %p39_p9 = scmp.eq.s32.totalorder %s854_s27, 0 }
  0x17   : > { %p44_p10 = scmp.ne.s32.totalorder %s846_s25, %s842_s24  ;;  %p194_p13 = scmp.eq.s32.totalorder %s925_s8, 1 }
  0x18   : > { %s955_s23 = scalar_select %p29_p7, %s850_s26, %s31_s22  }
  0x19   : > { %p957_p11 = por %p39_p9, %p38_p8  ;;  %p963_p12 = por %p45_p1, %p44_p10 }
  0x1a   : > { %p200_p0 = scmp.eq.s32.totalorder %s597_s19, 1  ;;  %p643_p2 = scmp.lt.s32.totalorder %s854_s27, 2 }
  0x1b   : > { %s260_s30 = sand.u32 1, %s850_s26   ;;  %p970_p4 = por %p194_p13, %p38_p8 }
  0x1c   : > { %p974_p6 = por %p200_p0, %p44_p10  ;;  %s602_s12 = sshll.u32 %s260_s30, 3 }
  0x1d   : > { %s603_s13 = sshll.u32 %s854_s27, 3  ;;  %s264_s17 = scalar_lea.vmem [#allocation2], %s602_s12 }
  0x1e   : > { %s268_s16 = scalar_lea.hbm %s1062_s0, %s603_s13  ;;  %s272_s18 = sshll.u32 %s264_s17, 4  ;;  %s273_s18 = int_to_ptr.vmem [resolvable:$true] %s272_s18 }
  0x1f   : > { %s270_s21 = sshll.u32 %s268_s16, 4  ;;  %p984_p7 = pnand %p643_p2, %p957_p11  ;;  %s271_s21 = int_to_ptr.hbm [resolvable:$true] %s270_s21 }
  0x20   : > { %s261_s22 = scalar_lea.sflag [#allocation3], %s260_s30  ;;  %s754_s3 = sshra.s32 %s271_s21, 4  ;;  %s755_s3 = int_to_ptr.hbm [resolvable:$true] %s754_s3 }
  0x21   : > { %s756_s5 = scalar_lea.hbm %s755_s3, 8  ;;  %p758_p9 = pneg %p984_p7 }
  0x22   : > { %p757_p8 = scmp.ne.s32.totalorder %s755_s3, %s756_s5  ;;  %s761_s14 = scalar_lea.hbm %s1062_s0, 16 }
  0x23   : > { %p762_p11 = scmp.lt.s32.totalorder %s755_s3, %s1062_s0  ;;  %p763_p0 = scmp.lt.s32.totalorder %s761_s14, %s756_s5 }
  0x24   : > { %p759_p10 = pnand %p758_p9, %p757_p8 }
  0x25   : > { %p764_p2 = por %p763_p0, %p762_p11 }
  0x26   : > { %p760_p13 = pneg %p759_p10 }
  0x28   : > { %p765_p5 = pnand %p764_p2, %p760_p13 }
  0x2a   : > { %768 = shalt.err (!%p765_p5)
}
  0x2b   : > { %636 = dma.hbm_to_vmem [thread:$0]  (!%p984_p7), %s271_s21, 128, %s273_s18, %s261_s22  }
  0x2c   : > { %281 = sbr.rel (%p930_p3) target bundleno = 629 (0x275), region = 48  ;;  %s1001_s30 = sand.u32 (!%p930_p3), 1, %s846_s25  }
  0x2d   : > { %s605_s16 = sshll.u32 (!%p930_p3), %s1001_s30, 3  ;;  %s284_s17 = scalar_lea.sflag (!%p930_p3), [#allocation3], %s1001_s30 }
  0x2e   : > { %s287_s3 = scalar_lea.vmem (!%p930_p3), [#allocation2], %s605_s16 }
  0x31   : > { %829 = dma.done.wait (%p963_p12), %s284_s17, 128  }
  0x32   : > { %831 = vsyncadd (%p963_p12), %s284_s17, 4294967168 }
  0x33   : > { %833 = dma.done.wait (%p45_p1), [#allocation6], 4096  }
  0x34   : > { %835 = vsyncadd (%p45_p1), [#allocation6], 4294963200  ;;  %v329_v0 = vld [vmem:[%s287_s3] sm:$0xff]  ;;  %v860_v1 = vmov 128.0   ;;  %v380_v14 = vld [vmem:[#allocation5 + $0x68] sm:$0xff]  ;;  %s611_s22 = sshll.u32 %s925_s8, 3 }
  0x35   : > { %330 = vadd.xlane.f32.xlu0 %v329_v0  ;;  %688 = vrcp.f32 %v860_v1  ;;  %v382_v2 = vld [vmem:[#allocation5 + $0x78] sm:$0xff]  ;;  %v381_v3 = vld [vmem:[#allocation5 + $0x70] sm:$0xff]  ;;  %v379_v15 = vld [vmem:[#allocation5 + $0x60] sm:$0xff]  ;;  %s503_s14 = scalar_lea.hbm %s1069_s7, %s611_s22  ;;  %s328_s17 = scalar_lea.vmem [#allocation8], %s605_s16 }
  0x36   : > { %387 = vmatpush.msra.mxu0 %v382_v2  ;;  %v378_v16 = vld [vmem:[#allocation5 + $0x58] sm:$0xff]  ;;  %v377_v17 = vld [vmem:[#allocation5 + $0x50] sm:$0xff]  ;;  %v376_v18 = vld [vmem:[#allocation5 + $0x48] sm:$0xff]  ;;  %s505_s3 = sshll.u32 %s328_s17, 4  ;;  %s507_s5 = sshll.u32 %s503_s14, 4  ;;  %s506_s3 = int_to_ptr.vmem [resolvable:$true] %s505_s3  ;;  %s508_s5 = int_to_ptr.hbm [resolvable:$true] %s507_s5 }
  0x37   : > { %v375_v19 = vld [vmem:[#allocation5 + $0x40] sm:$0xff]  ;;  %v374_v20 = vld [vmem:[#allocation5 + $0x38] sm:$0xff]  ;;  %v373_v21 = vld [vmem:[#allocation5 + $0x30] sm:$0xff]  ;;  %s493_s9 = scalar_lea.sflag [#allocation4], %s1001_s30  ;;  %s798_s8 = sshra.s32 %s508_s5, 4  ;;  %s799_s8 = int_to_ptr.hbm [resolvable:$true] %s798_s8 }
  0x38   : > { %388 = vmatpush.msra.mxu0 %v381_v3  ;;  %v372_v22 = vld [vmem:[#allocation5 + $0x28] sm:$0xff]  ;;  %v371_v23 = vld [vmem:[#allocation5 + $0x20] sm:$0xff]  ;;  %v370_v24 = vld [vmem:[#allocation5 + $0x18] sm:$0xff]  ;;  %s800_s29 = scalar_lea.hbm %s799_s8, 8  ;;  %s804_s19 = scalar_lea.hbm %s1069_s7, 16 }
  0x39   : > { %v369_v25 = vld [vmem:[#allocation5 + $0x10] sm:$0xff]  ;;  %v368_v26 = vld [vmem:[#allocation5 + $0x8] sm:$0xff]  ;;  %v367_v27 = vld [vmem:[#allocation5] sm:$0xff]  ;;  %p801_p1 = scmp.ne.s32.totalorder %s799_s8, %s800_s29  ;;  %p805_p12 = scmp.lt.s32.totalorder %s799_s8, %s1069_s7 }
  0x3a   : > { %389 = vmatpush.msra.mxu0 %v380_v14  ;;  %v684_v37 = vld [vmem:[%s1063_s1] ss:$0 sm:$0xff]  ;;  %v466_v43 = vld [vmem:[#allocation7 + $0x78] sm:$0xff]  ;;  %v464_v45 = vld [vmem:[#allocation7 + $0x68] sm:$0xff]  ;;  %p806_p7 = scmp.lt.s32.totalorder %s804_s19, %s800_s29 }
  0x3b   : > { %v689_v4 = vpop.eup %688  ;;  %v685_v40 = vld [vmem:[%s1064_s2] ss:$0 sm:$0xff]  ;;  %471 = vmatpush.msra.mxu1 %v466_v43  ;;  %v463_v46 = vld [vmem:[#allocation7 + $0x60] sm:$0xff]  ;;  %v462_v48 = vld [vmem:[#allocation7 + $0x58] sm:$0xff]  ;;  %p802_p3 = pnand %p801_p1, %p970_p4 }
  0x3c   : > { %v333_v5 = vmul.f32 128.0, %v689_v4  ;;  %vm337_vm0 = vweird.f32 %v689_v4  ;;  %390 = vmatpush.msra.mxu0 %v379_v15  ;;  %v465_v44 = vld [vmem:[#allocation7 + $0x70] sm:$0xff]  ;;  %v460_v51 = vld [vmem:[#allocation7 + $0x48] sm:$0xff]  ;;  %v459_v53 = vld [vmem:[#allocation7 + $0x40] sm:$0xff]  ;;  %p807_p8 = por %p806_p7, %p805_p12 }
  0x3d   : > { %472 = vmatpush.msra.mxu1 %v465_v44  ;;  %v686_v47 = vld [vmem:[%s1066_s4] ss:$0 sm:$0xff]  ;;  %v458_v55 = vld [vmem:[#allocation7 + $0x38] sm:$0xff]  ;;  %v456_v59 = vld [vmem:[#allocation7 + $0x28] sm:$0xff]  ;;  %p803_p5 = pneg %p802_p3 }
  0x3e   : > { %v334_v6 = vsub.f32 1.0, %v333_v5  ;;  %391 = vmatpush.msra.mxu0 %v378_v16  ;;  %v461_v49 = vld [vmem:[#allocation7 + $0x50] sm:$0xff]  ;;  %v455_v62 = vld [vmem:[#allocation7 + $0x20] sm:$0xff]  ;;  %v454_v1 = vld [vmem:[#allocation7 + $0x18] sm:$0xff] }
  0x3f   : > { %473 = vmatpush.msra.mxu1 %v464_v45  ;;  %v457_v57 = vld [vmem:[#allocation7 + $0x30] sm:$0xff]  ;;  %p808_p9 = pnand %p807_p8, %p803_p5 }
  0x40   : > { %v335_v7 = vmul.f32 %v689_v4, %v334_v6  ;;  %392 = vmatpush.msra.mxu0 %v377_v17 }
  0x41   : > { %474 = vmatpush.msra.mxu1 %v463_v46 }
  0x42   : > { %v336_v8 = vadd.f32 %v689_v4, %v335_v7  ;;  %393 = vmatpush.msra.mxu0 %v376_v18  ;;  %v452_v7 = vld [vmem:[#allocation7 + $0x8] sm:$0xff] }
  0x43   : > { %475 = vmatpush.msra.mxu1 %v462_v48 }
  0x44   : > { %v338_v9 = vsel %vm337_vm0, %v689_v4, %v336_v8  ;;  %394 = vmatpush.msra.mxu0 %v375_v19  ;;  %v453_v4 = vld [vmem:[#allocation7 + $0x10] sm:$0xff] }
  0x45   : > { %476 = vmatpush.msra.mxu1 %v461_v49 }
  0x46   : > { %395 = vmatpush.msra.mxu0 %v374_v20 }
  0x47   : > { %477 = vmatpush.msra.mxu1 %v460_v51 }
  0x48   : > { %396 = vmatpush.msra.mxu0 %v373_v21 }
  0x49   : > { %478 = vmatpush.msra.mxu1 %v459_v53 }
  0x4a   : > { %397 = vmatpush.msra.mxu0 %v372_v22 }
  0x4b   : > { %479 = vmatpush.msra.mxu1 %v458_v55 }
  0x4c   : > { %398 = vmatpush.msra.mxu0 %v371_v23 }
  0x4d   : > { %480 = vmatpush.msra.mxu1 %v457_v57 }
  0x4e   : > { %399 = vmatpush.msra.mxu0 %v370_v24 }
  0x4f   : > { %481 = vmatpush.msra.mxu1 %v456_v59 }
  0x50   : > { %400 = vmatpush.msra.mxu0 %v369_v25 }
  0x51   : > { %482 = vmatpush.msra.mxu1 %v455_v62 }
  0x52   : > { %401 = vmatpush.msra.mxu0 %v368_v26 }
  0x53   : > { %483 = vmatpush.msra.mxu1 %v454_v1 }
  0x54   : > { %402 = vmatpush.msra.mxu0 %v367_v27 }
  0x55   : > { %484 = vmatpush.msra.mxu1 %v453_v4 }
  0x57   : > { %485 = vmatpush.msra.mxu1 %v452_v7 }
  0xa8   : > { %v331_v10 = vpop.xlane.xlu0 %330 }
  0xa9   : > { %v339_v11 = vmul.f32 %v338_v9, %v331_v10 }
  0xab   : > { %v340_v12 = vsub.f32 %v329_v0, %v339_v11 }
  0xad   : > { %v341_v13 = vmul.f32 %v340_v12, %v340_v12 }
  0xaf   : > { %342 = vadd.xlane.f32.xlu0 %v341_v13 }
 0x122   : > { %v343_v28 = vpop.xlane.xlu0 %342 }
 0x123   : > { %v344_v29 = vmul.f32 %v343_v28, %v338_v9  ;;  %v451_v9 = vld [vmem:[#allocation7] sm:$0xff] }
 0x124   : > { %486 = vmatpush.msra.mxu1 %v451_v9 }
 0x125   : > { %v345_v30 = vadd.f32 1e-05, %v344_v29 }
 0x127   : > { %690 = vrsqrt.f32 %v345_v30  ;;  %vm352_vm2 = vweird.f32 %v345_v30 }
 0x12d   : > { %v691_v31 = vpop.eup %690 }
 0x12e   : > { %v347_v32 = vmul.f32 %v691_v31, %v345_v30  ;;  %vm353_vm1 = vweird.f32 %v691_v31 }
 0x12f   : > { %vm354_vm3 = vmor %vm352_vm2, %vm353_vm1 }
 0x130   : > { %v348_v33 = vmul.f32 %v691_v31, %v347_v32 }
 0x132   : > { %v349_v34 = vmul.f32 0.5, %v348_v33 }
 0x134   : > { %v350_v35 = vsub.f32 1.5, %v349_v34 }
 0x136   : > { %v351_v36 = vmul.f32 %v691_v31, %v350_v35 }
 0x138   : > { %v355_v38 = vsel %vm354_vm3, %v691_v31, %v351_v36 }
 0x139   : > { %v356_v39 = vmul.f32 %v355_v38, %v340_v12 }
 0x13b   : > { %v361_v41 = vmul.f32 %v684_v37, %v356_v39  ;;  %v687_v37 = vld [vmem:[%s1068_s6] ss:$0 sm:$0xff] }
 0x13d   : > { %v366_v42 = vadd.f32 %v685_v40, %v361_v41 }
 0x13f   : > { %403 = vmatmul.f32.vlgmr.msra.gmra.mxu0 %v366_v42 }
 0x1bc   : > { %v404_v50 = vpop.f32.mrf.mxu0 }
 0x1bd   : > { %v405_v52 = vadd.f32 %v686_v47, %v404_v50 }
 0x1bf   : > { %v408_v54 = vmul.f32 0.70710677, %v405_v52  ;;  %v407_v34 = vmul.f32 0.5, %v405_v52 }
 0x1c1   : > { %v409_v56 = vmul.f32 %v408_v54, %v408_v54 }
 0x1c3   : > { %v410_v58 = vmin.f32 %v409_v56, 16.0 }
 0x1c5   : > { %v411_v60 = vmul.f32 2.1237322e-06, %v410_v58  ;;  %v422_v61 = vmul.f32 3.8918573e-05, %v410_v58 }
 0x1c7   : > { %v412_v63 = vadd.f32 0.00028619796, %v411_v60  ;;  %v423_v0 = vadd.f32 0.001143296, %v422_v61 }
 0x1c9   : > { %v413_v2 = vmul.f32 %v412_v63, %v410_v58  ;;  %v424_v3 = vmul.f32 %v423_v0, %v410_v58 }
 0x1cb   : > { %v425_v5 = vadd.f32 0.014752088, %v424_v3  ;;  %v414_v6 = vadd.f32 0.0036580483, %v413_v2 }
 0x1cd   : > { %v426_v8 = vmul.f32 %v425_v5, %v410_v58  ;;  %v415_v11 = vmul.f32 %v414_v6, %v410_v58 }
 0x1cf   : > { %v427_v10 = vadd.f32 0.112945676, %v426_v8  ;;  %v416_v14 = vadd.f32 0.05243302, %v415_v11 }
 0x1d1   : > { %v428_v12 = vmul.f32 %v427_v10, %v410_v58  ;;  %v417_v17 = vmul.f32 %v416_v14, %v410_v58 }
 0x1d3   : > { %v429_v13 = vadd.f32 0.4994258, %v428_v12  ;;  %v418_v18 = vadd.f32 0.18741608, %v417_v17 }
 0x1d5   : > { %v430_v15 = vmul.f32 %v429_v13, %v410_v58  ;;  %v419_v20 = vmul.f32 %v418_v18, %v410_v58 }
 0x1d7   : > { %v431_v16 = vadd.f32 1.0, %v430_v15  ;;  %v420_v24 = vadd.f32 1.1283791, %v419_v20 }
 0x1d9   : > { %692 = vrcp.f32 %v431_v16  ;;  %v443_v23 = vand.u32 2147483648, %v431_v16  ;;  %v441_v26 = vand.u32 2147483647, %v431_v16  ;;  %vm437_vm5 = vweird.f32 %v431_v16 }
 0x1da   : > { %v421_v29 = vmul.f32 %v420_v24, %v408_v54 }
 0x1db   : > { %v444_v28 = vor.u32 1.1754944e-38, %v443_v23  ;;  %vm442_vm7 = vcmp.eq.f32.partialorder %v441_v26, 8.507059e+37 }
 0x1df   : > { %v693_v19 = vpop.eup %692 }
 0x1e0   : > { %v433_v21 = vmul.f32 %v693_v19, %v431_v16  ;;  %vm438_vm4 = vweird.f32 %v693_v19 }
 0x1e1   : > { %vm439_vm6 = vmor %vm437_vm5, %vm438_vm4 }
 0x1e2   : > { %v434_v22 = vsub.f32 1.0, %v433_v21 }
 0x1e4   : > { %v435_v25 = vmul.f32 %v693_v19, %v434_v22 }
 0x1e6   : > { %v436_v27 = vadd.f32 %v693_v19, %v435_v25 }
 0x1e8   : > { %v440_v30 = vsel %vm439_vm6, %v693_v19, %v436_v27 }
 0x1e9   : > { %v445_v31 = vsel %vm442_vm7, %v444_v28, %v440_v30 }
 0x1ea   : > { %v446_v32 = vmul.f32 %v445_v31, %v421_v29 }
 0x1ec   : > { %v609_v33 = vclamps-f32 %v446_v32, 1.0 }
 0x1ee   : > { %v449_v35 = vadd.f32 1.0, %v609_v33 }
 0x1f0   : > { %v450_v36 = vmul.f32 %v449_v35, %v407_v34 }
 0x1f2   : > { %487 = vmatmul.f32.vlgmr.msra.gmra.mxu1 %v450_v36 }
 0x26f   : > { %v488_v38 = vpop.f32.mrf.mxu1 }
 0x270   : > { %v489_v39 = vadd.f32 %v687_v37, %v488_v38 }
 0x272   : > { %491 = vst [vmem:[%s328_s17] sm:$0xff] %v489_v39 }
 0x273   : > { %811 = shalt.err (!%p808_p9)
}
 0x274   : > { %624 = dma.vmem_to_hbm [thread:$0]  (%p970_p4), %s506_s3, 128, %s508_s5, %s493_s9  }
 0x275 PF: > { %s519_s30 = sand.u32 1, %s842_s24   ;;  %p1080_p10 = scmp.ge.s32.totalorder %s854_s27, 2 }
 0x276   : > { %s520_s12 = scalar_lea.sflag [#allocation4], %s519_s30 }
 0x277   : > { %p638_p13 = pnand %p1080_p10, %p974_p6 }
 0x279   : > { %p639_p11 = pneg %p638_p13 }
 0x27b   : > { %837 = dma.done.wait (%p639_p11), %s520_s12, 128  }
 0x27c   : > { %839 = vsyncadd (%p639_p11), %s520_s12, 4294967168  ;;  %p21_p0 = scmp.ge.s32.totalorder %s944_s20, 4   ;;  %s1081_s24 = smov %s846_s25 }
 0x27d   : > { %s1082_s25 = smov %s850_s26  ;;  %s1083_s26 = smov %s955_s23 }
 0x27e   : > { %s1084_s27 = smov %s944_s20  ;;  %23 = sbr.rel (!%p21_p0) target bundleno = 9 (0x9), region = 101 }
 0x283   :  { %526 = vsyncpa [#allocation3], 1 }
 0x284   :  { %528 = vsyncpa [#allocation3 + $0x1], 1 }
 0x285   :  { %529 = vsyncpa [#allocation6], 1 }
 0x286   :  { %530 = vsyncpa [#allocation4], 1 }
 0x287   :  { %532 = vsyncpa [#allocation4 + $0x1], 1 }

</bundles_post_ra>
